<compile_context>
chip_gen: v7x
topology: tpu7x:2x2x1
jax: 0.10.0
libtpu: 0.0.40
codegen_flags: <defaults>
</compile_context>

<pallas_src>
import functools

import jax
import jax.numpy as jnp
from jax.experimental import pallas as pl
from jax.experimental.pallas import tpu as pltpu


def make_vanilla_rnn_kernel(num_layers, seq_len, nb):
    """Builds the Pallas kernel body (traced once; Python loops unroll).

    nb = rows of the batch-stacked operands (2*batch when the symmetric
    pos/neg passes are stacked along the batch axis, else batch).
    """

    def kernel(*refs):
        # ---- unpack refs: inputs..., output, scratch ----
        x_ref, h0_ref = refs[0], refs[1]
        idx = 2
        w_ih0_ref, w_hh0_ref, b0_ref = refs[idx], refs[idx + 1], refs[idx + 2]
        idx += 3
        w_ih_refs, w_hh_refs, b_refs = [], [], []
        for _ in range(num_layers - 1):
            w_ih_refs.append(refs[idx])
            w_hh_refs.append(refs[idx + 1])
            b_refs.append(refs[idx + 2])
            idx += 3
        w_dec_ref, b_dec_ref = refs[idx], refs[idx + 1]
        out_ref = refs[idx + 2]
        hs_ref = refs[idx + 3]          # VMEM scratch (T*nb, H), f32, aligned

        mxu_dtype = w_hh0_ref.dtype     # bf16 (or f32 for the check path)

        # Hoist all weight loads and the per-layer bias broadcast out of the
        # recurrence (no per-step reloads / re-broadcasts).
        w_hh0 = w_hh0_ref[...]                                # (H, H)
        w_ih = [r[...] for r in w_ih_refs]                    # each (H, H)
        w_hh = [r[...] for r in w_hh_refs]                    # each (H, H)
        H = w_hh0.shape[-1]
        bias_b = [jnp.broadcast_to(r[...], (nb, H)) for r in b_refs]

        # Layer-0 input projection for the whole (stacked) sequence: ONE
        # matmul instead of T per-step matmuls; layer-0 bias folded in.
        x_proj = (jnp.dot(x_ref[...], w_ih0_ref[...],
                          preferred_element_type=jnp.float32)
                  + b0_ref[...])                              # (T*nb, H) f32

        h = [h0_ref[l] for l in range(num_layers)]            # each (nb, H) f32

        for t in range(seq_len):
            # Layer 0: only the recurrent matmul stays on the serial path.
            h[0] = jnp.tanh(
                x_proj[t * nb:(t + 1) * nb]
                + jnp.dot(h[0].astype(mxu_dtype), w_hh0,
                          preferred_element_type=jnp.float32))
            # Layers >= 1: two tiny matmuls (no lane-offset concat at H < 128).
            for l in range(1, num_layers):
                pre = (jnp.dot(h[l - 1].astype(mxu_dtype), w_ih[l - 1],
                               preferred_element_type=jnp.float32)
                       + jnp.dot(h[l].astype(mxu_dtype), w_hh[l - 1],
                                 preferred_element_type=jnp.float32)
                       + bias_b[l - 1])
                h[l] = jnp.tanh(pre)
            # One aligned (nb, H) f32 store per step at static row offset t*nb
            # (nb = 8 rows -> sublane-aligned).  Bounds live ranges; no
            # per-step sub-tile slices survive the loop.
            hs_ref[t * nb:(t + 1) * nb, :] = h[num_layers - 1]

        # Decoder for the whole sequence off the aligned scratch: one matmul,
        # one bias add, one store.  The pos/neg flip-combine + sigmoid happen
        # in the wrapper on the tiny (T, nb, O) result.
        y = (jnp.dot(hs_ref[...].astype(mxu_dtype), w_dec_ref[...],
                     preferred_element_type=jnp.float32)
             + b_dec_ref[...])
        out_ref[...] = y.astype(out_ref.dtype)

    return kernel


def vanilla_rnn_forward(x, h0, params, *, symmetric, allow_negative_values,
                        mxu_dtype=jnp.bfloat16):
    """Wrapper: prepares stacked/cast operands, calls the Pallas kernel, and
    performs the (lane-unfriendly, tiny) pos/neg combine outside the kernel."""
    B, T, I = x.shape
    L, _, H = h0.shape
    O = params["w_dec"].shape[1]
    dtype = x.dtype
    f32 = jnp.float32

    if symmetric:
        # `inputs * [[-1, 1]]` pass stacked along the batch axis so both the
        # positive and sign-flipped recurrences share every matmul.
        sign = jnp.asarray([-1.0, 1.0], dtype=dtype)          # input_size == 2
        x_both = jnp.concatenate([x, x * sign], axis=0)       # (2B, T, I)
        h0_both = jnp.concatenate([h0, h0], axis=1)           # (L, 2B, H)
        nb = 2 * B
    else:
        x_both, h0_both, nb = x, h0, B

    # Time-major 2D layout: row index = t*nb + b.  MXU operands in mxu_dtype
    # (bf16), biases / state init / accumulation in f32.
    x2d = jnp.transpose(x_both, (1, 0, 2)).reshape(T * nb, I).astype(mxu_dtype)
    h0_k = h0_both.astype(f32)

    w_ih0 = params["w_ih"][0].astype(mxu_dtype)               # (I, H)
    w_hh0 = params["w_hh"][0].astype(mxu_dtype)               # (H, H)
    b0 = (params["b_ih"][0] + params["b_hh"][0]).astype(f32)  # (1, H) pre-sum

    inputs = [x2d, h0_k, w_ih0, w_hh0, b0]
    for l in range(1, L):
        inputs += [params["w_ih"][l].astype(mxu_dtype),
                   params["w_hh"][l].astype(mxu_dtype),
                   (params["b_ih"][l] + params["b_hh"][l]).astype(f32)]
    inputs += [params["w_dec"].astype(mxu_dtype),
               params["b_dec"].astype(f32)]

    kernel = make_vanilla_rnn_kernel(L, T, nb)
    y = pl.pallas_call(
        kernel,
        out_shape=jax.ShapeDtypeStruct((T * nb, O), f32),
        in_specs=[pl.BlockSpec(memory_space=pltpu.MemorySpace.VMEM)]
        * len(inputs),
        out_specs=pl.BlockSpec(memory_space=pltpu.MemorySpace.VMEM),
        scratch_shapes=[pltpu.VMEM((T * nb, H), f32)],
        compiler_params=pltpu.CompilerParams(
            vmem_limit_bytes=32 * 1024 * 1024),
    )(*inputs)

    # Tiny post-processing on (T, nb, O): keeps the below-(8,128) splits and
    # the axis=-1 flip out of the kernel (they were XLU relayouts there).
    y = y.reshape(T, nb, O)
    if symmetric:
        y = (y[:, :B] + jnp.flip(y[:, B:], axis=-1)) / 2
    if not allow_negative_values:
        y = jax.nn.sigmoid(y)
    return jnp.transpose(y, (1, 0, 2)).astype(dtype)          # (B, T, O)


def vanilla_rnn_reference(x, h0, params, *, symmetric, allow_negative_values):
    """Pure-JAX f32 reference reproducing the PyTorch forward semantics."""
    L = h0.shape[0]
    T = x.shape[1]
    x_neg = x * jnp.array([[[-1.0, 1.0]]], dtype=x.dtype)

    def run(xx):
        h = [h0[l] for l in range(L)]
        outs = []
        for t in range(T):
            inp = xx[:, t, :]
            for l in range(L):
                h[l] = jnp.tanh(inp @ params["w_ih"][l] + params["b_ih"][l]
                                + h[l] @ params["w_hh"][l] + params["b_hh"][l])
                inp = h[l]
            outs.append(h[-1])
        return jnp.stack(outs, axis=1)                        # (B, T, H)

    y_p = run(x) @ params["w_dec"] + params["b_dec"]
    y_n = run(x_neg) @ params["w_dec"] + params["b_dec"]
    out = (y_p + jnp.flip(y_n, axis=2)) / 2 if symmetric else y_p
    if not allow_negative_values:
        out = jax.nn.sigmoid(out)
    return out


if __name__ == "__main__":
    # Module hyper-parameters (small, consistent with the forward pass).
    input_size = 2          # forced by `inputs * [[-1, 1]]`
    state_size = 32
    output_size = 2
    num_layers = 2
    symmetric = True
    allow_negative_values = False

    batch = 4
    seq = 8
    dtype = jnp.float32

    key = jax.random.PRNGKey(0)
    keys = jax.random.split(key, 4 * num_layers + 3)
    scale = 1.0 / jnp.sqrt(jnp.float32(state_size))

    # Deterministic parameter init (PyTorch-style uniform range, synthetic).
    # Weights stored already transposed to (in_features, out_features).
    w_ih, w_hh, b_ih, b_hh = [], [], [], []
    ki = 0
    for l in range(num_layers):
        in_dim = input_size if l == 0 else state_size
        w_ih.append(jax.random.uniform(keys[ki], (in_dim, state_size),
                                       dtype, -scale, scale)); ki += 1
        w_hh.append(jax.random.uniform(keys[ki], (state_size, state_size),
                                       dtype, -scale, scale)); ki += 1
        b_ih.append(jax.random.uniform(keys[ki], (1, state_size),
                                       dtype, -scale, scale)); ki += 1
        b_hh.append(jax.random.uniform(keys[ki], (1, state_size),
                                       dtype, -scale, scale)); ki += 1
    w_dec = jax.random.uniform(keys[ki], (state_size, output_size),
                               dtype, -scale, scale); ki += 1
    b_dec = jax.random.uniform(keys[ki], (1, output_size),
                               dtype, -scale, scale); ki += 1
    params = {"w_ih": w_ih, "w_hh": w_hh, "b_ih": b_ih, "b_hh": b_hh,
              "w_dec": w_dec, "b_dec": b_dec}

    x = jax.random.normal(keys[ki], (batch, seq, input_size), dtype)
    h0 = jnp.zeros((num_layers, batch, state_size), dtype)    # init_hidden()

    ref = vanilla_rnn_reference(x, h0, params, symmetric=symmetric,
                                allow_negative_values=allow_negative_values)

    # f32-MXU path: tight check that the kernel structure is exact.
    fwd_f32 = functools.partial(vanilla_rnn_forward, symmetric=symmetric,
                                allow_negative_values=allow_negative_values,
                                mxu_dtype=jnp.float32)
    out_f32 = jax.block_until_ready(fwd_f32(x, h0, params))
    assert out_f32.shape == (batch, seq, output_size)
    assert jnp.allclose(out_f32, ref, atol=1e-5, rtol=1e-5), \
        "f32 kernel mismatch vs reference"

    # bf16-MXU path (perf default): bf16 operand rounding compounds over the
    # T-step tanh recurrence, so validate at a bf16-appropriate tolerance.
    fwd_bf16 = functools.partial(vanilla_rnn_forward, symmetric=symmetric,
                                 allow_negative_values=allow_negative_values,
                                 mxu_dtype=jnp.bfloat16)
    out_bf16 = jax.block_until_ready(fwd_bf16(x, h0, params))
    assert out_bf16.shape == (batch, seq, output_size)
    assert jnp.allclose(out_bf16, ref, atol=2e-2, rtol=2e-2), \
        "bf16 kernel mismatch vs reference"

    print("KERNEL_OK")
</pallas_src>

<mosaic_0001>
module attributes {stable_mosaic.version = 11 : i64} {
  func.func @kernel(%arg0: memref<64x2xf32, #tpu.memory_space<vmem>>, %arg1: memref<2x8x32xf32, #tpu.memory_space<vmem>>, %arg2: memref<2x32xf32, #tpu.memory_space<vmem>>, %arg3: memref<32x32xf32, #tpu.memory_space<vmem>>, %arg4: memref<1x32xf32, #tpu.memory_space<vmem>>, %arg5: memref<32x32xf32, #tpu.memory_space<vmem>>, %arg6: memref<32x32xf32, #tpu.memory_space<vmem>>, %arg7: memref<1x32xf32, #tpu.memory_space<vmem>>, %arg8: memref<32x2xf32, #tpu.memory_space<vmem>>, %arg9: memref<1x2xf32, #tpu.memory_space<vmem>>, %arg10: memref<64x2xf32, #tpu.memory_space<vmem>>, %arg11: memref<64x32xf32, #tpu.memory_space<vmem>>) attributes {dimension_semantics = [], scalar_prefetch = 0 : i64, scratch_operands = 1 : i64, tpu.core_type = #tpu.core_type<tc>} {
    %c0 = arith.constant 0 : index
    %c0_0 = arith.constant 0 : index
    %0 = vector.load %arg3[%c0, %c0_0] : memref<32x32xf32, #tpu.memory_space<vmem>>, vector<32x32xf32>
    %c0_1 = arith.constant 0 : index
    %c0_2 = arith.constant 0 : index
    %1 = vector.load %arg5[%c0_1, %c0_2] : memref<32x32xf32, #tpu.memory_space<vmem>>, vector<32x32xf32>
    %c0_3 = arith.constant 0 : index
    %c0_4 = arith.constant 0 : index
    %2 = vector.load %arg6[%c0_3, %c0_4] : memref<32x32xf32, #tpu.memory_space<vmem>>, vector<32x32xf32>
    %c0_5 = arith.constant 0 : index
    %c0_6 = arith.constant 0 : index
    %3 = vector.load %arg7[%c0_5, %c0_6] : memref<1x32xf32, #tpu.memory_space<vmem>>, vector<1x32xf32>
    %4 = vector.shape_cast %3 : vector<1x32xf32> to vector<1x32xf32>
    %5 = vector.broadcast %4 : vector<1x32xf32> to vector<8x32xf32>
    %c0_7 = arith.constant 0 : index
    %c0_8 = arith.constant 0 : index
    %6 = vector.load %arg0[%c0_7, %c0_8] : memref<64x2xf32, #tpu.memory_space<vmem>>, vector<64x2xf32>
    %c0_9 = arith.constant 0 : index
    %c0_10 = arith.constant 0 : index
    %7 = vector.load %arg2[%c0_9, %c0_10] : memref<2x32xf32, #tpu.memory_space<vmem>>, vector<2x32xf32>
    %cst = arith.constant dense<0.000000e+00> : vector<64x32xf32>
    %8 = tpu.matmul %6, %7, %cst {dimension_numbers = #tpu.dot_dimension_numbers<[1], [0], [0], [1], [0, 0, 1, 1], [], []>} : vector<64x2xf32>, vector<2x32xf32>, vector<64x32xf32> -> vector<64x32xf32>
    %c0_11 = arith.constant 0 : index
    %c0_12 = arith.constant 0 : index
    %9 = vector.load %arg4[%c0_11, %c0_12] : memref<1x32xf32, #tpu.memory_space<vmem>>, vector<1x32xf32>
    %10 = vector.broadcast %9 : vector<1x32xf32> to vector<64x32xf32>
    %11 = arith.addf %8, %10 : vector<64x32xf32>
    %c0_13 = arith.constant 0 : index
    %c0_14 = arith.constant 0 : index
    %c0_15 = arith.constant 0 : index
    %12 = vector.load %arg1[%c0_13, %c0_14, %c0_15] : memref<2x8x32xf32, #tpu.memory_space<vmem>>, vector<1x8x32xf32>
    %13 = vector.shape_cast %12 : vector<1x8x32xf32> to vector<8x32xf32>
    %c1 = arith.constant 1 : index
    %c0_16 = arith.constant 0 : index
    %c0_17 = arith.constant 0 : index
    %14 = vector.load %arg1[%c1, %c0_16, %c0_17] : memref<2x8x32xf32, #tpu.memory_space<vmem>>, vector<1x8x32xf32>
    %15 = vector.shape_cast %14 : vector<1x8x32xf32> to vector<8x32xf32>
    %16 = vector.extract_strided_slice %11 {offsets = [0, 0], sizes = [8, 32], strides = [1, 1]} : vector<64x32xf32> to vector<8x32xf32>
    %cst_18 = arith.constant dense<0.000000e+00> : vector<8x32xf32>
    %17 = tpu.matmul %13, %0, %cst_18 {dimension_numbers = #tpu.dot_dimension_numbers<[1], [0], [0], [1], [0, 0, 1, 1], [], []>} : vector<8x32xf32>, vector<32x32xf32>, vector<8x32xf32> -> vector<8x32xf32>
    %18 = arith.addf %16, %17 : vector<8x32xf32>
    %19 = math.tanh %18 : vector<8x32xf32>
    %cst_19 = arith.constant dense<0.000000e+00> : vector<8x32xf32>
    %20 = tpu.matmul %19, %1, %cst_19 {dimension_numbers = #tpu.dot_dimension_numbers<[1], [0], [0], [1], [0, 0, 1, 1], [], []>} : vector<8x32xf32>, vector<32x32xf32>, vector<8x32xf32> -> vector<8x32xf32>
    %cst_20 = arith.constant dense<0.000000e+00> : vector<8x32xf32>
    %21 = tpu.matmul %15, %2, %cst_20 {dimension_numbers = #tpu.dot_dimension_numbers<[1], [0], [0], [1], [0, 0, 1, 1], [], []>} : vector<8x32xf32>, vector<32x32xf32>, vector<8x32xf32> -> vector<8x32xf32>
    %22 = arith.addf %20, %21 : vector<8x32xf32>
    %23 = arith.addf %22, %5 : vector<8x32xf32>
    %24 = math.tanh %23 : vector<8x32xf32>
    %c0_21 = arith.constant 0 : index
    %c0_22 = arith.constant 0 : index
    %25 = vector.load %arg11[%c0_21, %c0_22] : memref<64x32xf32, #tpu.memory_space<vmem>>, vector<8x32xf32>
    tpu.vector_store %arg11[%c0_21, %c0_22], %24 {strides = array<i32>} : memref<64x32xf32, #tpu.memory_space<vmem>>, vector<8x32xf32>,
    %26 = vector.extract_strided_slice %11 {offsets = [8, 0], sizes = [8, 32], strides = [1, 1]} : vector<64x32xf32> to vector<8x32xf32>
    %cst_23 = arith.constant dense<0.000000e+00> : vector<8x32xf32>
    %27 = tpu.matmul %19, %0, %cst_23 {dimension_numbers = #tpu.dot_dimension_numbers<[1], [0], [0], [1], [0, 0, 1, 1], [], []>} : vector<8x32xf32>, vector<32x32xf32>, vector<8x32xf32> -> vector<8x32xf32>
    %28 = arith.addf %26, %27 : vector<8x32xf32>
    %29 = math.tanh %28 : vector<8x32xf32>
    %cst_24 = arith.constant dense<0.000000e+00> : vector<8x32xf32>
    %30 = tpu.matmul %29, %1, %cst_24 {dimension_numbers = #tpu.dot_dimension_numbers<[1], [0], [0], [1], [0, 0, 1, 1], [], []>} : vector<8x32xf32>, vector<32x32xf32>, vector<8x32xf32> -> vector<8x32xf32>
    %cst_25 = arith.constant dense<0.000000e+00> : vector<8x32xf32>
    %31 = tpu.matmul %24, %2, %cst_25 {dimension_numbers = #tpu.dot_dimension_numbers<[1], [0], [0], [1], [0, 0, 1, 1], [], []>} : vector<8x32xf32>, vector<32x32xf32>, vector<8x32xf32> -> vector<8x32xf32>
    %32 = arith.addf %30, %31 : vector<8x32xf32>
    %33 = arith.addf %32, %5 : vector<8x32xf32>
    %34 = math.tanh %33 : vector<8x32xf32>
    %c8 = arith.constant 8 : index
    %c0_26 = arith.constant 0 : index
    %35 = vector.load %arg11[%c8, %c0_26] : memref<64x32xf32, #tpu.memory_space<vmem>>, vector<8x32xf32>
    tpu.vector_store %arg11[%c8, %c0_26], %34 {strides = array<i32>} : memref<64x32xf32, #tpu.memory_space<vmem>>, vector<8x32xf32>,
    %36 = vector.extract_strided_slice %11 {offsets = [16, 0], sizes = [8, 32], strides = [1, 1]} : vector<64x32xf32> to vector<8x32xf32>
    %cst_27 = arith.constant dense<0.000000e+00> : vector<8x32xf32>
    %37 = tpu.matmul %29, %0, %cst_27 {dimension_numbers = #tpu.dot_dimension_numbers<[1], [0], [0], [1], [0, 0, 1, 1], [], []>} : vector<8x32xf32>, vector<32x32xf32>, vector<8x32xf32> -> vector<8x32xf32>
    %38 = arith.addf %36, %37 : vector<8x32xf32>
    %39 = math.tanh %38 : vector<8x32xf32>
    %cst_28 = arith.constant dense<0.000000e+00> : vector<8x32xf32>
    %40 = tpu.matmul %39, %1, %cst_28 {dimension_numbers = #tpu.dot_dimension_numbers<[1], [0], [0], [1], [0, 0, 1, 1], [], []>} : vector<8x32xf32>, vector<32x32xf32>, vector<8x32xf32> -> vector<8x32xf32>
    %cst_29 = arith.constant dense<0.000000e+00> : vector<8x32xf32>
    %41 = tpu.matmul %34, %2, %cst_29 {dimension_numbers = #tpu.dot_dimension_numbers<[1], [0], [0], [1], [0, 0, 1, 1], [], []>} : vector<8x32xf32>, vector<32x32xf32>, vector<8x32xf32> -> vector<8x32xf32>
    %42 = arith.addf %40, %41 : vector<8x32xf32>
    %43 = arith.addf %42, %5 : vector<8x32xf32>
    %44 = math.tanh %43 : vector<8x32xf32>
    %c16 = arith.constant 16 : index
    %c0_30 = arith.constant 0 : index
    %45 = vector.load %arg11[%c16, %c0_30] : memref<64x32xf32, #tpu.memory_space<vmem>>, vector<8x32xf32>
    tpu.vector_store %arg11[%c16, %c0_30], %44 {strides = array<i32>} : memref<64x32xf32, #tpu.memory_space<vmem>>, vector<8x32xf32>,
    %46 = vector.extract_strided_slice %11 {offsets = [24, 0], sizes = [8, 32], strides = [1, 1]} : vector<64x32xf32> to vector<8x32xf32>
    %cst_31 = arith.constant dense<0.000000e+00> : vector<8x32xf32>
    %47 = tpu.matmul %39, %0, %cst_31 {dimension_numbers = #tpu.dot_dimension_numbers<[1], [0], [0], [1], [0, 0, 1, 1], [], []>} : vector<8x32xf32>, vector<32x32xf32>, vector<8x32xf32> -> vector<8x32xf32>
    %48 = arith.addf %46, %47 : vector<8x32xf32>
    %49 = math.tanh %48 : vector<8x32xf32>
    %cst_32 = arith.constant dense<0.000000e+00> : vector<8x32xf32>
    %50 = tpu.matmul %49, %1, %cst_32 {dimension_numbers = #tpu.dot_dimension_numbers<[1], [0], [0], [1], [0, 0, 1, 1], [], []>} : vector<8x32xf32>, vector<32x32xf32>, vector<8x32xf32> -> vector<8x32xf32>
    %cst_33 = arith.constant dense<0.000000e+00> : vector<8x32xf32>
    %51 = tpu.matmul %44, %2, %cst_33 {dimension_numbers = #tpu.dot_dimension_numbers<[1], [0], [0], [1], [0, 0, 1, 1], [], []>} : vector<8x32xf32>, vector<32x32xf32>, vector<8x32xf32> -> vector<8x32xf32>
    %52 = arith.addf %50, %51 : vector<8x32xf32>
    %53 = arith.addf %52, %5 : vector<8x32xf32>
    %54 = math.tanh %53 : vector<8x32xf32>
    %c24 = arith.constant 24 : index
    %c0_34 = arith.constant 0 : index
    %55 = vector.load %arg11[%c24, %c0_34] : memref<64x32xf32, #tpu.memory_space<vmem>>, vector<8x32xf32>
    tpu.vector_store %arg11[%c24, %c0_34], %54 {strides = array<i32>} : memref<64x32xf32, #tpu.memory_space<vmem>>, vector<8x32xf32>,
    %56 = vector.extract_strided_slice %11 {offsets = [32, 0], sizes = [8, 32], strides = [1, 1]} : vector<64x32xf32> to vector<8x32xf32>
    %cst_35 = arith.constant dense<0.000000e+00> : vector<8x32xf32>
    %57 = tpu.matmul %49, %0, %cst_35 {dimension_numbers = #tpu.dot_dimension_numbers<[1], [0], [0], [1], [0, 0, 1, 1], [], []>} : vector<8x32xf32>, vector<32x32xf32>, vector<8x32xf32> -> vector<8x32xf32>
    %58 = arith.addf %56, %57 : vector<8x32xf32>
    %59 = math.tanh %58 : vector<8x32xf32>
    %cst_36 = arith.constant dense<0.000000e+00> : vector<8x32xf32>
    %60 = tpu.matmul %59, %1, %cst_36 {dimension_numbers = #tpu.dot_dimension_numbers<[1], [0], [0], [1], [0, 0, 1, 1], [], []>} : vector<8x32xf32>, vector<32x32xf32>, vector<8x32xf32> -> vector<8x32xf32>
    %cst_37 = arith.constant dense<0.000000e+00> : vector<8x32xf32>
    %61 = tpu.matmul %54, %2, %cst_37 {dimension_numbers = #tpu.dot_dimension_numbers<[1], [0], [0], [1], [0, 0, 1, 1], [], []>} : vector<8x32xf32>, vector<32x32xf32>, vector<8x32xf32> -> vector<8x32xf32>
    %62 = arith.addf %60, %61 : vector<8x32xf32>
    %63 = arith.addf %62, %5 : vector<8x32xf32>
    %64 = math.tanh %63 : vector<8x32xf32>
    %c32 = arith.constant 32 : index
    %c0_38 = arith.constant 0 : index
    %65 = vector.load %arg11[%c32, %c0_38] : memref<64x32xf32, #tpu.memory_space<vmem>>, vector<8x32xf32>
    tpu.vector_store %arg11[%c32, %c0_38], %64 {strides = array<i32>} : memref<64x32xf32, #tpu.memory_space<vmem>>, vector<8x32xf32>,
    %66 = vector.extract_strided_slice %11 {offsets = [40, 0], sizes = [8, 32], strides = [1, 1]} : vector<64x32xf32> to vector<8x32xf32>
    %cst_39 = arith.constant dense<0.000000e+00> : vector<8x32xf32>
    %67 = tpu.matmul %59, %0, %cst_39 {dimension_numbers = #tpu.dot_dimension_numbers<[1], [0], [0], [1], [0, 0, 1, 1], [], []>} : vector<8x32xf32>, vector<32x32xf32>, vector<8x32xf32> -> vector<8x32xf32>
    %68 = arith.addf %66, %67 : vector<8x32xf32>
    %69 = math.tanh %68 : vector<8x32xf32>
    %cst_40 = arith.constant dense<0.000000e+00> : vector<8x32xf32>
    %70 = tpu.matmul %69, %1, %cst_40 {dimension_numbers = #tpu.dot_dimension_numbers<[1], [0], [0], [1], [0, 0, 1, 1], [], []>} : vector<8x32xf32>, vector<32x32xf32>, vector<8x32xf32> -> vector<8x32xf32>
    %cst_41 = arith.constant dense<0.000000e+00> : vector<8x32xf32>
    %71 = tpu.matmul %64, %2, %cst_41 {dimension_numbers = #tpu.dot_dimension_numbers<[1], [0], [0], [1], [0, 0, 1, 1], [], []>} : vector<8x32xf32>, vector<32x32xf32>, vector<8x32xf32> -> vector<8x32xf32>
    %72 = arith.addf %70, %71 : vector<8x32xf32>
    %73 = arith.addf %72, %5 : vector<8x32xf32>
    %74 = math.tanh %73 : vector<8x32xf32>
    %c40 = arith.constant 40 : index
    %c0_42 = arith.constant 0 : index
    %75 = vector.load %arg11[%c40, %c0_42] : memref<64x32xf32, #tpu.memory_space<vmem>>, vector<8x32xf32>
    tpu.vector_store %arg11[%c40, %c0_42], %74 {strides = array<i32>} : memref<64x32xf32, #tpu.memory_space<vmem>>, vector<8x32xf32>,
    %76 = vector.extract_strided_slice %11 {offsets = [48, 0], sizes = [8, 32], strides = [1, 1]} : vector<64x32xf32> to vector<8x32xf32>
    %cst_43 = arith.constant dense<0.000000e+00> : vector<8x32xf32>
    %77 = tpu.matmul %69, %0, %cst_43 {dimension_numbers = #tpu.dot_dimension_numbers<[1], [0], [0], [1], [0, 0, 1, 1], [], []>} : vector<8x32xf32>, vector<32x32xf32>, vector<8x32xf32> -> vector<8x32xf32>
    %78 = arith.addf %76, %77 : vector<8x32xf32>
    %79 = math.tanh %78 : vector<8x32xf32>
    %cst_44 = arith.constant dense<0.000000e+00> : vector<8x32xf32>
    %80 = tpu.matmul %79, %1, %cst_44 {dimension_numbers = #tpu.dot_dimension_numbers<[1], [0], [0], [1], [0, 0, 1, 1], [], []>} : vector<8x32xf32>, vector<32x32xf32>, vector<8x32xf32> -> vector<8x32xf32>
    %cst_45 = arith.constant dense<0.000000e+00> : vector<8x32xf32>
    %81 = tpu.matmul %74, %2, %cst_45 {dimension_numbers = #tpu.dot_dimension_numbers<[1], [0], [0], [1], [0, 0, 1, 1], [], []>} : vector<8x32xf32>, vector<32x32xf32>, vector<8x32xf32> -> vector<8x32xf32>
    %82 = arith.addf %80, %81 : vector<8x32xf32>
    %83 = arith.addf %82, %5 : vector<8x32xf32>
    %84 = math.tanh %83 : vector<8x32xf32>
    %c48 = arith.constant 48 : index
    %c0_46 = arith.constant 0 : index
    %85 = vector.load %arg11[%c48, %c0_46] : memref<64x32xf32, #tpu.memory_space<vmem>>, vector<8x32xf32>
    tpu.vector_store %arg11[%c48, %c0_46], %84 {strides = array<i32>} : memref<64x32xf32, #tpu.memory_space<vmem>>, vector<8x32xf32>,
    %86 = vector.extract_strided_slice %11 {offsets = [56, 0], sizes = [8, 32], strides = [1, 1]} : vector<64x32xf32> to vector<8x32xf32>
    %cst_47 = arith.constant dense<0.000000e+00> : vector<8x32xf32>
    %87 = tpu.matmul %79, %0, %cst_47 {dimension_numbers = #tpu.dot_dimension_numbers<[1], [0], [0], [1], [0, 0, 1, 1], [], []>} : vector<8x32xf32>, vector<32x32xf32>, vector<8x32xf32> -> vector<8x32xf32>
    %88 = arith.addf %86, %87 : vector<8x32xf32>
    %89 = math.tanh %88 : vector<8x32xf32>
    %cst_48 = arith.constant dense<0.000000e+00> : vector<8x32xf32>
    %90 = tpu.matmul %89, %1, %cst_48 {dimension_numbers = #tpu.dot_dimension_numbers<[1], [0], [0], [1], [0, 0, 1, 1], [], []>} : vector<8x32xf32>, vector<32x32xf32>, vector<8x32xf32> -> vector<8x32xf32>
    %cst_49 = arith.constant dense<0.000000e+00> : vector<8x32xf32>
    %91 = tpu.matmul %84, %2, %cst_49 {dimension_numbers = #tpu.dot_dimension_numbers<[1], [0], [0], [1], [0, 0, 1, 1], [], []>} : vector<8x32xf32>, vector<32x32xf32>, vector<8x32xf32> -> vector<8x32xf32>
    %92 = arith.addf %90, %91 : vector<8x32xf32>
    %93 = arith.addf %92, %5 : vector<8x32xf32>
    %94 = math.tanh %93 : vector<8x32xf32>
    %c56 = arith.constant 56 : index
    %c0_50 = arith.constant 0 : index
    %95 = vector.load %arg11[%c56, %c0_50] : memref<64x32xf32, #tpu.memory_space<vmem>>, vector<8x32xf32>
    tpu.vector_store %arg11[%c56, %c0_50], %94 {strides = array<i32>} : memref<64x32xf32, #tpu.memory_space<vmem>>, vector<8x32xf32>,
    %c0_51 = arith.constant 0 : index
    %c0_52 = arith.constant 0 : index
    %96 = vector.load %arg11[%c0_51, %c0_52] : memref<64x32xf32, #tpu.memory_space<vmem>>, vector<64x32xf32>
    %c0_53 = arith.constant 0 : index
    %c0_54 = arith.constant 0 : index
    %97 = vector.load %arg8[%c0_53, %c0_54] : memref<32x2xf32, #tpu.memory_space<vmem>>, vector<32x2xf32>
    %cst_55 = arith.constant dense<0.000000e+00> : vector<64x2xf32>
    %98 = tpu.matmul %96, %97, %cst_55 {dimension_numbers = #tpu.dot_dimension_numbers<[1], [0], [0], [1], [0, 0, 1, 1], [], []>} : vector<64x32xf32>, vector<32x2xf32>, vector<64x2xf32> -> vector<64x2xf32>
    %c0_56 = arith.constant 0 : index
    %c0_57 = arith.constant 0 : index
    %99 = vector.load %arg9[%c0_56, %c0_57] : memref<1x2xf32, #tpu.memory_space<vmem>>, vector<1x2xf32>
    %100 = vector.broadcast %99 : vector<1x2xf32> to vector<64x2xf32>
    %101 = arith.addf %98, %100 : vector<64x2xf32>
    %c0_58 = arith.constant 0 : index
    %c0_59 = arith.constant 0 : index
    %102 = vector.load %arg10[%c0_58, %c0_59] : memref<64x2xf32, #tpu.memory_space<vmem>>, vector<64x2xf32>
    tpu.vector_store %arg10[%c0_58, %c0_59], %101 {strides = array<i32>} : memref<64x2xf32, #tpu.memory_space<vmem>>, vector<64x2xf32>,
    return
  }
}

</mosaic_0001>

<bundles_post_ra>
// kernel: tpu_custom_call.1
= control target key start
LH: loop header
LB: loop body
LE: loop exit
PB: predicated region body
PF: predicated region fallthrough
CT: control target
= control target key end

     0   :  { %15 = vsyncpa [#allocation4], 0  ;;  %s2853_s13 = smov [#allocation3]   ;;  %s3285_s0 = inlined_call_operand.vmem [shape: f32[64,2], index: 0, kind: input, shape index: {}]   ;;  %s3286_s1 = inlined_call_operand.hbm [shape: f32[2,8,32], index: 1, kind: input, shape index: {}]   ;;  %s3287_s2 = inlined_call_operand.vmem [shape: f32[2,32], index: 2, kind: input, shape index: {}]   ;;  %s3288_s3 = inlined_call_operand.vmem [shape: f32[32,32], index: 3, kind: input, shape index: {}]   ;;  %s3289_s4 = inlined_call_operand.vmem [shape: f32[1,32], index: 4, kind: input, shape index: {}]   ;;  %s3290_s5 = inlined_call_operand.vmem [shape: f32[32,32], index: 5, kind: input, shape index: {}]   ;;  %s3291_s6 = inlined_call_operand.vmem [shape: f32[32,32], index: 6, kind: input, shape index: {}]   ;;  %s3292_s7 = inlined_call_operand.vmem [shape: f32[1,32], index: 7, kind: input, shape index: {}]   ;;  %s3293_s8 = inlined_call_operand.vmem [shape: f32[32,2], index: 8, kind: input, shape index: {}]   ;;  %s3294_s9 = inlined_call_operand.vmem [shape: f32[1,2], index: 9, kind: input, shape index: {}]   ;;  %s3295_s10 = inlined_call_operand.vmem [shape: f32[64,2], index: 10, kind: output, shape index: {}]  }
   0x1   :  { %s23_s14 = sshll.u32 %s2853_s13, 4  ;;  %s2829_s17 = scalar_lea.hbm %s3286_s1, 256  ;;  %s24_s14 = int_to_ptr.vmem [resolvable:$true] %s23_s14 }
   0x2   :  { %p2830_p0 = scmp.ne.s32.totalorder %s3286_s1, %s2829_s17  ;;  %p2833_p1 = scmp.lt.u32.totalorder %s2829_s17, %s3286_s1 }
   0x4   :  { %p2835_p2 = pnand %p2833_p1, %p2830_p0 }
   0x6   :  { %2838 = shalt.err (!%p2835_p2)
}
   0x7   :  { %s2839_s22 = scalar_lea.vmem %s24_s14, 256  ;;  %p2844_p4 = scmp.lt.s32.totalorder %s24_s14, %s24_s14 }
   0x8   :  { %p2840_p3 = scmp.ne.s32.totalorder %s24_s14, %s2839_s22  ;;  %p2845_p5 = scmp.lt.s32.totalorder %s2839_s22, %s2839_s22 }
   0xa   :  { %p2846_p6 = por %p2845_p5, %p2844_p4 }
   0xc   :  { %p2847_p7 = pnand %p2846_p6, %p2840_p3 }
   0xe   :  { %2850 = shalt.err (!%p2847_p7)
}
   0xf   :  { %s2854_s23 = smov 128   ;;  %s2855_s24 = smov 8  }
  0x10   :  { %29 = dma.hbm_to_vmem [thread:$0]  %s3286_s1, 256, %s24_s14, [#allocation4], %s2854_s23, %s2854_s23, %s2855_s24  }
  0x11   :  { %2851 = dma.done.wait [#allocation4], 256  }
  0x12   :  { %2852 = vsyncadd [#allocation4], 4294967040  ;;  %vm109_vm0 = vcmask 1041408   ;;  %vm84_vm1 = vcmask 15360   ;;  %v76_v0 = vld [vmem:[%s3287_s2] sm:$0x3] }
  0x13   :  { %v72_v1 = vld [vmem:[%s3285_s0 + $0x20] sm:$0xff]  ;;  %v73_v2 = vld [vmem:[%s3285_s0 + $0x28] sm:$0xff]  ;;  %2789 = vmatprep.subr.msk.mxu1 %vm109_vm0, %v76_v0  ;;  %v74_v5 = vld [vmem:[%s3285_s0 + $0x30] sm:$0xff]  ;;  %2339 = vmatprep.subr.msk.mxu0 %vm109_vm0, %v76_v0  ;;  %v2856_v8 = vmov 0.0|0.0   ;;  %vm2857_vm2 = vmmov 0   ;;  %v2858_v14 = vmov 0.0  }
  0x14   :  { %2347 = vmatprep.mubr.msk.f32.mxu1 %vm84_vm1, %v72_v1  ;;  %v49_v3 = vld [vmem:[%s3288_s3] sm:$0xff]  ;;  %v50_v4 = vld [vmem:[%s3288_s3 + $0x8] sm:$0xff]  ;;  %2790 = vmatpush3.msk.msra.mxu1 %vm109_vm0, %v76_v0  ;;  %v51_v10 = vld [vmem:[%s3288_s3 + $0x10] sm:$0xff]  ;;  %vm221_vm3 = vcmask 261120  }
  0x15   :  { %v2947_v6 = vpack.c.bf16 %v50_v4, %v49_v3  ;;  %v68_v7 = vld [vmem:[%s3285_s0] sm:$0xff]  ;;  %2348 = vmatmul.mubr.msk.f32.vlgmr.msra.gmra.mrb[0].mxu1 %vm84_vm1, %v73_v2  ;;  %2637 = vmatprep.subr.bf16.mxu1 %v2856_v8  ;;  %v69_v9 = vld [vmem:[%s3285_s0 + $0x8] sm:$0xff]  ;;  %v52_v11 = vld [vmem:[%s3288_s3 + $0x18] sm:$0xff] }
  0x16   :  { %2350 = vmatprep.mubr.msk.f32.mxu1 %vm84_vm1, %v74_v5  ;;  %v75_v12 = vld [vmem:[%s3285_s0 + $0x38] sm:$0xff]  ;;  %v2969_v13 = vpack.c.bf16 %v52_v11, %v51_v10  ;;  %2340 = vmatpush3.msk.msra.mxu0 %vm109_vm0, %v76_v0  ;;  %v218_v15 = vld [vmem:[#allocation3] sm:$0xff]  ;;  %v58_v17 = vld [vmem:[%s3291_s6 + $0x8] sm:$0xff] }
  0x17   :  { %2639 = vmatpush3.bf16.msra.mxu1 %v2947_v6  ;;  %2341 = vmatprep.mubr.msk.f32.mxu0 %vm84_vm1, %v68_v7  ;;  %v57_v16 = vld [vmem:[%s3291_s6] sm:$0xff]  ;;  %v59_v19 = vld [vmem:[%s3291_s6 + $0x10] sm:$0xff]  ;;  %v60_v20 = vld [vmem:[%s3291_s6 + $0x18] sm:$0xff] }
  0x18   :  { %2640 = vmatprep.subr.bf16.mxu1 %v2856_v8  ;;  %2342 = vmatmul.mubr.msk.f32.vlgmr.msra.gmra.mrb[0].mxu0 %vm84_vm1, %v69_v9  ;;  %v2990_v18 = vpack.c.bf16 %v58_v17, %v57_v16  ;;  %v3000_v21 = vpack.c.bf16 %v60_v20, %v59_v19  ;;  %v220_v22 = vld [vmem:[#allocation3 + $0x8] sm:$0xff]  ;;  %v53_v23 = vld [vmem:[%s3290_s5] sm:$0xff]  ;;  %v70_v26 = vld [vmem:[%s3285_s0 + $0x10] sm:$0xff] }
  0x19   :  { %2351 = vmatmul.mubr.msk.f32.gmra.mrb[2].mxu1 %vm84_vm1, %v75_v12  ;;  %2649 = vmatprep.subr.bf16.mxu0 %v2856_v8  ;;  %v54_v24 = vld [vmem:[%s3290_s5 + $0x8] sm:$0xff]  ;;  %v71_v27 = vld [vmem:[%s3285_s0 + $0x18] sm:$0xff]  ;;  %v55_v28 = vld [vmem:[%s3290_s5 + $0x10] sm:$0xff] }
  0x1a   :  { %2361 = vmatprep.mubr.msk.f32.mxu1 %vm2857_vm2, %v2858_v14  ;;  %v3010_v25 = vpack.c.bf16 %v54_v24, %v53_v23  ;;  %2344 = vmatprep.mubr.msk.f32.mxu0 %vm84_vm1, %v70_v26  ;;  %v56_v29 = vld [vmem:[%s3290_s5 + $0x18] sm:$0xff]  ;;  %v3048_v34 = vld [vmem:[%s3289_s4] ss:$0 sm:$0xff] }
  0x1b   :  { %2642 = vmatpush3.bf16.msra.mxu1 %v2969_v13  ;;  %v3027_v30 = vpack.c.bf16 %v56_v29, %v55_v28  ;;  %v3075_v48 = vld [vmem:[%s3292_s7] ss:$0 sm:$0xff] }
  0x1c   :  { %2643 = vmatprep.subr.bf16.mxu1 %v2856_v8  ;;  %2651 = vmatpush3.bf16.msra.mxu0 %v3010_v25 }
  0x1d   :  { %2345 = vmatmul.mubr.msk.f32.gmra.mrb[2].mxu0 %vm84_vm1, %v71_v27  ;;  %2652 = vmatprep.subr.bf16.mxu0 %v2856_v8 }
  0x1e   :  { %2362 = vmatmul.mubr.msk.f32.vlgmr.msra.gmra.mrb[4].mxu1 %vm221_vm3, %v218_v15  ;;  %2383 = vmatprep.mubr.msk.f32.mxu0 %vm2857_vm2, %v2858_v14 }
  0x1f   :  { %2372 = vmatprep.mubr.msk.f32.mxu1 %vm2857_vm2, %v2858_v14  ;;  %2645 = vmatpush3.bf16.msra.mxu1 %v2990_v18 }
  0x20   :  { %2646 = vmatprep.subr.bf16.mxu1 %v2856_v8  ;;  %2654 = vmatpush3.bf16.msra.mxu0 %v3027_v30 }
  0x21   :  { %2661 = vmatprep.subr.bf16.mxu0 %v2856_v8 }
  0x23   :  { %2648 = vmatpush3.bf16.msra.mxu1 %v3000_v21 }
  0x24   :  { %2655 = vmatprep.subr.bf16.mxu1 %v2856_v8 }
  0x26   :  { %2373 = vmatmul.mubr.msk.f32.vlgmr.msra.gmra.mrb[6].mxu1 %vm221_vm3, %v220_v22 }
  0x27   :  { %2657 = vmatpush3.bf16.msra.mxu1 %v2947_v6  ;;  %2394 = vmatprep.mubr.msk.f32.mxu1 %vm2857_vm2, %v2858_v14 }
  0x28   :  { %2658 = vmatprep.subr.bf16.mxu1 %v2856_v8 }
  0x2b   :  { %2660 = vmatpush3.bf16.msra.mxu1 %v2969_v13 }
  0x2c   :  { %2667 = vmatprep.subr.bf16.mxu1 %v2856_v8 }
  0xe8   :  { %v3041_v31 = vpop.f32.mrb[0].mxu1 }
  0xe9   :  { %v3043_v32 = vpop.f32.mrb[1].mxu1 }
  0xeb   :  { %v2343_v33 = vpop.f32.mrb[0].mxu0 }
  0xec   :  { %v3050_v35 = vpop.f32.mrb[2].mxu1  ;;  %v179_v36 = vpop.f32.mrb[1].mxu0  ;;  %v185_v47 = vadd.f32 %v2343_v33, %v3048_v34 }
  0xed   :  { %v3052_v37 = vpop.f32.mrb[3].mxu1  ;;  %v180_v38 = vadd.f32 %v3048_v34, %v179_v36  ;;  %v200_v36 = vadd.f32 %v3048_v34, %v3043_v32 }
  0xf0   :  { %v3069_v44 = vpop.f32.mrb[2].mxu0 }
  0xf1   :  { %v291_v39 = vpop.f32.mrb[4].mxu1  ;;  %v189_v46 = vpop.f32.mrb[3].mxu0  ;;  %v195_v11 = vadd.f32 %v3069_v44, %v3048_v34 }
  0xf2   :  { %v295_v40 = vadd.f32 %v291_v39, %v180_v38  ;;  %v2363_v41 = vpop.f32.mrb[5].mxu1  ;;  %v190_v0 = vadd.f32 %v3048_v34, %v189_v46 }
  0xf4   :  { %2797 = vtanh.f32 %v295_v40 }
  0xf9   :  { %v366_v43 = vpop.f32.mrb[6].mxu1 }
  0xfa   :  { %v2374_v45 = vpop.f32.mrb[7].mxu1 }
  0xfe   :  { %v2798_v42 = vpop.eup %2797 }
  0xff   :  { %2384 = vmatmul.mubr.msk.f32.vlgmr.msra.gmra.mrb[4].mxu0 %vm221_vm3, %v2798_v42  ;;  %2395 = vmatmul.mubr.msk.f32.vlgmr.msra.gmra.mrb[8].mxu1 %vm221_vm3, %v2798_v42 }
 0x100   :  { %2669 = vmatpush3.bf16.msra.mxu1 %v3010_v25  ;;  %2663 = vmatpush3.bf16.msra.mxu0 %v2990_v18 }
 0x101   :  { %2670 = vmatprep.subr.bf16.mxu1 %v2856_v8  ;;  %2664 = vmatprep.subr.bf16.mxu0 %v2856_v8 }
 0x102   :  { %2416 = vmatprep.mubr.msk.f32.mxu1 %vm2857_vm2, %v2858_v14  ;;  %2405 = vmatprep.mubr.msk.f32.mxu0 %vm2857_vm2, %v2858_v14 }
 0x104   :  { %2672 = vmatpush3.bf16.msra.mxu1 %v3027_v30  ;;  %2666 = vmatpush3.bf16.msra.mxu0 %v3000_v21 }
 0x105   :  { %2673 = vmatprep.subr.bf16.mxu0 %v2856_v8  ;;  %2679 = vmatprep.subr.bf16.mxu1 %v2856_v8 }
 0x1d2   :  { %v439_v49 = vpop.f32.mrb[4].mxu0  ;;  %v512_v50 = vpop.f32.mrb[8].mxu1 }
 0x1d3   :  { %v440_v51 = vadd.f32 %v439_v49, %v366_v43  ;;  %v516_v52 = vadd.f32 %v512_v50, %v185_v47  ;;  %v2385_v53 = vpop.f32.mrb[5].mxu0  ;;  %v2396_v54 = vpop.f32.mrb[9].mxu1  ;;  %v205_v47 = vadd.f32 %v3041_v31, %v3048_v34 }
 0x1d5   :  { %v443_v55 = vadd.f32 %v3075_v48, %v440_v51  ;;  %2799 = vtanh.f32 %v516_v52 }
 0x1d7   :  { %2801 = vtanh.f32 %v443_v55 }
 0x1df   :  { %v2800_v56 = vpop.eup %2799 }
 0x1e0   :  { %2417 = vmatmul.mubr.msk.f32.vlgmr.msra.gmra.mrb[10].mxu1 %vm221_vm3, %v2800_v56 }
 0x1e1   :  { %v2802_v57 = vpop.eup %2801  ;;  %2681 = vmatpush3.bf16.msra.mxu1 %v2990_v18  ;;  %2438 = vmatprep.mubr.msk.f32.mxu1 %vm2857_vm2, %v2858_v14 }
 0x1e2   :  { %445 = vst.msk [vmem:[#allocation2] sm:$0xff] %vm221_vm3, %v2802_v57  ;;  %2406 = vmatmul.mubr.msk.f32.vlgmr.msra.gmra.mrb[6].mxu0 %vm221_vm3, %v2802_v57  ;;  %2682 = vmatprep.subr.bf16.mxu1 %v2856_v8 }
 0x1e3   :  { %2675 = vmatpush3.bf16.msra.mxu0 %v2947_v6  ;;  %2427 = vmatprep.mubr.msk.f32.mxu0 %vm2857_vm2, %v2858_v14 }
 0x1e4   :  { %2676 = vmatprep.subr.bf16.mxu0 %v2856_v8 }
 0x1e5   :  { %2684 = vmatpush3.bf16.msra.mxu1 %v3000_v21 }
 0x1e6   :  { %2691 = vmatprep.subr.bf16.mxu1 %v2856_v8 }
 0x1e7   :  { %2678 = vmatpush3.bf16.msra.mxu0 %v2969_v13 }
 0x1e8   :  { %2685 = vmatprep.subr.bf16.mxu0 %v2856_v8 }
 0x1ea   :  { %2428 = vmatmul.mubr.msk.f32.vlgmr.msra.gmra.mrb[8].mxu0 %vm221_vm3, %v2800_v56 }
 0x1eb   :  { %2687 = vmatpush3.bf16.msra.mxu0 %v3010_v25  ;;  %2449 = vmatprep.mubr.msk.f32.mxu0 %vm2857_vm2, %v2858_v14 }
 0x1ec   :  { %2688 = vmatprep.subr.bf16.mxu0 %v2856_v8 }
 0x1ef   :  { %2690 = vmatpush3.bf16.msra.mxu0 %v3027_v30 }
 0x1f0   :  { %2697 = vmatprep.subr.bf16.mxu0 %v2856_v8 }
 0x2b3   :  { %v660_v58 = vpop.f32.mrb[10].mxu1 }
 0x2b4   :  { %v2418_v59 = vpop.f32.mrb[11].mxu1 }
 0x2b5   :  { %v587_v60 = vpop.f32.mrb[6].mxu0 }
 0x2b6   :  { %v661_v61 = vadd.f32 %v660_v58, %v587_v60  ;;  %v2407_v62 = vpop.f32.mrb[7].mxu0  ;;  %v210_v60 = vadd.f32 %v3048_v34, %v3052_v37 }
 0x2b8   :  { %v664_v63 = vadd.f32 %v3075_v48, %v661_v61 }
 0x2ba   :  { %2803 = vtanh.f32 %v664_v63 }
 0x2bd   :  { %v733_v1 = vpop.f32.mrb[8].mxu0 }
 0x2be   :  { %v737_v2 = vadd.f32 %v733_v1, %v190_v0  ;;  %v2429_v3 = vpop.f32.mrb[9].mxu0 }
 0x2c0   :  { %2805 = vtanh.f32 %v737_v2 }
 0x2c4   :  { %v2804_v4 = vpop.eup %2803 }
 0x2c5   :  { %666 = vst.msk [vmem:[#allocation2 + $0x8] sm:$0xff] %vm221_vm3, %v2804_v4  ;;  %2439 = vmatmul.mubr.msk.f32.vlgmr.msra.gmra.mrb[12].mxu1 %vm221_vm3, %v2804_v4 }
 0x2c6   :  { %2693 = vmatpush3.bf16.msra.mxu1 %v2947_v6  ;;  %2460 = vmatprep.mubr.msk.f32.mxu1 %vm2857_vm2, %v2858_v14 }
 0x2c7   :  { %2694 = vmatprep.subr.bf16.mxu1 %v2856_v8 }
 0x2ca   :  { %v2806_v5 = vpop.eup %2805  ;;  %2696 = vmatpush3.bf16.msra.mxu1 %v2969_v13 }
 0x2cb   :  { %2450 = vmatmul.mubr.msk.f32.vlgmr.msra.gmra.mrb[10].mxu0 %vm221_vm3, %v2806_v5  ;;  %2703 = vmatprep.subr.bf16.mxu1 %v2856_v8 }
 0x2cc   :  { %2699 = vmatpush3.bf16.msra.mxu0 %v2990_v18  ;;  %2471 = vmatprep.mubr.msk.f32.mxu0 %vm2857_vm2, %v2858_v14 }
 0x2cd   :  { %2461 = vmatmul.mubr.msk.f32.vlgmr.msra.gmra.mrb[14].mxu1 %vm221_vm3, %v2806_v5  ;;  %2700 = vmatprep.subr.bf16.mxu0 %v2856_v8 }
 0x2ce   :  { %2705 = vmatpush3.bf16.msra.mxu1 %v3010_v25  ;;  %2482 = vmatprep.mubr.msk.f32.mxu1 %vm2857_vm2, %v2858_v14 }
 0x2cf   :  { %2706 = vmatprep.subr.bf16.mxu1 %v2856_v8 }
 0x2d0   :  { %2702 = vmatpush3.bf16.msra.mxu0 %v3000_v21 }
 0x2d1   :  { %2709 = vmatprep.subr.bf16.mxu0 %v2856_v8 }
 0x2d2   :  { %2708 = vmatpush3.bf16.msra.mxu1 %v3027_v30 }
 0x2d3   :  { %2715 = vmatprep.subr.bf16.mxu1 %v2856_v8 }
 0x398   :  { %v808_v7 = vpop.f32.mrb[12].mxu1 }
 0x399   :  { %v2440_v9 = vpop.f32.mrb[13].mxu1 }
 0x39a   :  { %v2004_v9 = vld [vmem:[%s3293_s8 + $0x18] sm:$0xff] }
 0x39e   :  { %v881_v10 = vpop.f32.mrb[10].mxu0 }
 0x39f   :  { %v882_v12 = vadd.f32 %v881_v10, %v808_v7  ;;  %v2451_v15 = vpop.f32.mrb[11].mxu0  ;;  %v2003_v7 = vld [vmem:[%s3293_s8 + $0x10] sm:$0xff] }
 0x3a0   :  { %v954_v16 = vpop.f32.mrb[14].mxu1  ;;  %v2785_v10 = vpack.c.bf16 %v2004_v9, %v2003_v7 }
 0x3a1   :  { %v885_v17 = vadd.f32 %v3075_v48, %v882_v12  ;;  %v958_v19 = vadd.f32 %v954_v16, %v195_v11  ;;  %v2462_v20 = vpop.f32.mrb[15].mxu1 }
 0x3a3   :  { %2807 = vtanh.f32 %v885_v17 }
 0x3a4   :  { %2809 = vtanh.f32 %v958_v19 }
 0x3ad   :  { %v2808_v22 = vpop.eup %2807 }
 0x3ae   :  { %v2810_v23 = vpop.eup %2809  ;;  %887 = vst.msk [vmem:[#allocation2 + $0x10] sm:$0xff] %vm221_vm3, %v2808_v22  ;;  %2472 = vmatmul.mubr.msk.f32.vlgmr.msra.gmra.mrb[12].mxu0 %vm221_vm3, %v2808_v22 }
 0x3af   :  { %2483 = vmatmul.mubr.msk.f32.vlgmr.msra.gmra.mrb[16].mxu1 %vm221_vm3, %v2810_v23  ;;  %2711 = vmatpush3.bf16.msra.mxu0 %v2947_v6 }
 0x3b0   :  { %2712 = vmatprep.subr.bf16.mxu0 %v2856_v8  ;;  %2493 = vmatprep.mubr.msk.f32.mxu0 %vm2857_vm2, %v2858_v14 }
 0x3b1   :  { %2717 = vmatpush3.bf16.msra.mxu1 %v2990_v18  ;;  %2504 = vmatprep.mubr.msk.f32.mxu1 %vm2857_vm2, %v2858_v14 }
 0x3b2   :  { %2718 = vmatprep.subr.bf16.mxu1 %v2856_v8 }
 0x3b3   :  { %2714 = vmatpush3.bf16.msra.mxu0 %v2969_v13 }
 0x3b4   :  { %2721 = vmatprep.subr.bf16.mxu0 %v2856_v8 }
 0x3b5   :  { %2720 = vmatpush3.bf16.msra.mxu1 %v3000_v21  ;;  %v1995_v15 = vld [vmem:[#allocation2 + $0x10] sm:$0xff] }
 0x3b6   :  { %2494 = vmatmul.mubr.msk.f32.vlgmr.msra.gmra.mrb[14].mxu0 %vm221_vm3, %v2810_v23  ;;  %2727 = vmatprep.subr.bf16.mxu1 %v2856_v8 }
 0x3b7   :  { %2723 = vmatpush3.bf16.msra.mxu0 %v3010_v25  ;;  %2515 = vmatprep.mubr.msk.f32.mxu0 %vm2857_vm2, %v2858_v14 }
 0x3b8   :  { %2724 = vmatprep.subr.bf16.mxu0 %v2856_v8 }
 0x3bb   :  { %2726 = vmatpush3.bf16.msra.mxu0 %v3027_v30 }
 0x3bc   :  { %2733 = vmatprep.subr.bf16.mxu0 %v2856_v8 }
 0x481   :  { %v1029_v24 = vpop.f32.mrb[12].mxu0 }
 0x482   :  { %v1102_v26 = vpop.f32.mrb[16].mxu1  ;;  %v2473_v27 = vpop.f32.mrb[13].mxu0 }
 0x483   :  { %v1103_v28 = vadd.f32 %v1102_v26, %v1029_v24  ;;  %v2484_v29 = vpop.f32.mrb[17].mxu1 }
 0x484   :  { %v2189_v29 = vld [vmem:[%s3294_s9] ss:$0 sm:$0xff] }
 0x485   :  { %v1106_v33 = vadd.f32 %v3075_v48, %v1103_v28 }
 0x487   :  { %2811 = vtanh.f32 %v1106_v33 }
 0x489   :  { %v1175_v38 = vpop.f32.mrb[14].mxu0 }
 0x48a   :  { %v1179_v39 = vadd.f32 %v1175_v38, %v200_v36  ;;  %v2495_v40 = vpop.f32.mrb[15].mxu0 }
 0x48c   :  { %2813 = vtanh.f32 %v1179_v39 }
 0x491   :  { %v2812_v41 = vpop.eup %2811 }
 0x492   :  { %1108 = vst.msk [vmem:[#allocation2 + $0x18] sm:$0xff] %vm221_vm3, %v2812_v41  ;;  %2505 = vmatmul.mubr.msk.f32.vlgmr.msra.gmra.mrb[18].mxu1 %vm221_vm3, %v2812_v41 }
 0x493   :  { %2729 = vmatpush3.bf16.msra.mxu1 %v2947_v6  ;;  %2526 = vmatprep.mubr.msk.f32.mxu1 %vm2857_vm2, %v2858_v14 }
 0x494   :  { %2730 = vmatprep.subr.bf16.mxu1 %v2856_v8 }
 0x496   :  { %v2814_v42 = vpop.eup %2813 }
 0x497   :  { %2732 = vmatpush3.bf16.msra.mxu1 %v2969_v13  ;;  %2516 = vmatmul.mubr.msk.f32.vlgmr.msra.gmra.mrb[16].mxu0 %vm221_vm3, %v2814_v42 }
 0x498   :  { %2735 = vmatpush3.bf16.msra.mxu0 %v2990_v18  ;;  %2739 = vmatprep.subr.bf16.mxu1 %v2856_v8 }
 0x499   :  { %2736 = vmatprep.subr.bf16.mxu0 %v2856_v8  ;;  %2537 = vmatprep.mubr.msk.f32.mxu0 %vm2857_vm2, %v2858_v14  ;;  %v1996_v16 = vld [vmem:[#allocation2 + $0x18] sm:$0xff] }
 0x49a   :  { %2527 = vmatmul.mubr.msk.f32.vlgmr.msra.gmra.mrb[20].mxu1 %vm221_vm3, %v2814_v42 }
 0x49b   :  { %2741 = vmatpush3.bf16.msra.mxu1 %v3010_v25  ;;  %2548 = vmatprep.mubr.msk.f32.mxu1 %vm2857_vm2, %v2858_v14 }
 0x49c   :  { %2738 = vmatpush3.bf16.msra.mxu0 %v3000_v21  ;;  %2742 = vmatprep.subr.bf16.mxu1 %v2856_v8 }
 0x49d   :  { %2745 = vmatprep.subr.bf16.mxu0 %v2856_v8 }
 0x49f   :  { %2744 = vmatpush3.bf16.msra.mxu1 %v3027_v30 }
 0x4a0   :  { %2751 = vmatprep.subr.bf16.mxu1 %v2856_v8 }
 0x565   :  { %v1250_v32 = vpop.f32.mrb[18].mxu1 }
 0x566   :  { %v2506_v43 = vpop.f32.mrb[19].mxu1 }
 0x56a   :  { %v1323_v44 = vpop.f32.mrb[16].mxu0 }
 0x56b   :  { %v1324_v45 = vadd.f32 %v1323_v44, %v1250_v32  ;;  %v2517_v46 = vpop.f32.mrb[17].mxu0 }
 0x56d   :  { %v1327_v49 = vadd.f32 %v3075_v48, %v1324_v45  ;;  %v1396_v50 = vpop.f32.mrb[20].mxu1 }
 0x56e   :  { %v1400_v51 = vadd.f32 %v1396_v50, %v205_v47  ;;  %v2528_v52 = vpop.f32.mrb[21].mxu1 }
 0x56f   :  { %2815 = vtanh.f32 %v1327_v49 }
 0x570   :  { %2817 = vtanh.f32 %v1400_v51 }
 0x579   :  { %v2816_v53 = vpop.eup %2815 }
 0x57a   :  { %v2818_v54 = vpop.eup %2817  ;;  %1329 = vst.msk [vmem:[#allocation2 + $0x20] sm:$0xff] %vm221_vm3, %v2816_v53  ;;  %2538 = vmatmul.mubr.msk.f32.vlgmr.msra.gmra.mrb[18].mxu0 %vm221_vm3, %v2816_v53 }
 0x57b   :  { %2549 = vmatmul.mubr.msk.f32.vlgmr.msra.gmra.mrb[22].mxu1 %vm221_vm3, %v2818_v54  ;;  %2747 = vmatpush3.bf16.msra.mxu0 %v2947_v6 }
 0x57c   :  { %2748 = vmatprep.subr.bf16.mxu0 %v2856_v8  ;;  %2559 = vmatprep.mubr.msk.f32.mxu0 %vm2857_vm2, %v2858_v14 }
 0x57d   :  { %2753 = vmatpush3.bf16.msra.mxu1 %v2990_v18  ;;  %2570 = vmatprep.mubr.msk.f32.mxu1 %vm2857_vm2, %v2858_v14 }
 0x57e   :  { %2754 = vmatprep.subr.bf16.mxu1 %v2856_v8 }
 0x57f   :  { %2750 = vmatpush3.bf16.msra.mxu0 %v2969_v13 }
 0x580   :  { %2757 = vmatprep.subr.bf16.mxu0 %v2856_v8 }
 0x581   :  { %2756 = vmatpush3.bf16.msra.mxu1 %v3000_v21  ;;  %v1997_v17 = vld [vmem:[#allocation2 + $0x20] sm:$0xff] }
 0x582   :  { %2560 = vmatmul.mubr.msk.f32.vlgmr.msra.gmra.mrb[20].mxu0 %vm221_vm3, %v2818_v54  ;;  %2763 = vmatprep.subr.bf16.mxu1 %v2856_v8 }
 0x583   :  { %2759 = vmatpush3.bf16.msra.mxu0 %v3010_v25  ;;  %2581 = vmatprep.mubr.msk.f32.mxu0 %vm2857_vm2, %v2858_v14 }
 0x584   :  { %2760 = vmatprep.subr.bf16.mxu0 %v2856_v8 }
 0x587   :  { %2762 = vmatpush3.bf16.msra.mxu0 %v3027_v30 }
 0x588   :  { %2769 = vmatprep.subr.bf16.mxu0 %v2856_v8 }
 0x64d   :  { %v1471_v31 = vpop.f32.mrb[18].mxu0 }
 0x64e   :  { %v1544_v55 = vpop.f32.mrb[22].mxu1  ;;  %v2539_v56 = vpop.f32.mrb[19].mxu0 }
 0x64f   :  { %v1545_v57 = vadd.f32 %v1544_v55, %v1471_v31  ;;  %v2550_v58 = vpop.f32.mrb[23].mxu1 }
 0x651   :  { %v1548_v59 = vadd.f32 %v3075_v48, %v1545_v57 }
 0x653   :  { %2819 = vtanh.f32 %v1548_v59 }
 0x655   :  { %v1617_v61 = vpop.f32.mrb[20].mxu0 }
 0x656   :  { %v1621_v62 = vadd.f32 %v1617_v61, %v210_v60  ;;  %v2561_v63 = vpop.f32.mrb[21].mxu0 }
 0x658   :  { %2821 = vtanh.f32 %v1621_v62 }
 0x65d   :  { %v2820_v0 = vpop.eup %2819 }
 0x65e   :  { %1550 = vst.msk [vmem:[#allocation2 + $0x28] sm:$0xff] %vm221_vm3, %v2820_v0  ;;  %2571 = vmatmul.mubr.msk.f32.vlgmr.msra.gmra.mrb[24].mxu1 %vm221_vm3, %v2820_v0 }
 0x65f   :  { %2765 = vmatpush3.bf16.msra.mxu1 %v2947_v6  ;;  %2592 = vmatprep.mubr.msk.f32.mxu1 %vm2857_vm2, %v2858_v14  ;;  %v2001_v6 = vld [vmem:[%s3293_s8] sm:$0xff] }
 0x660   :  { %2766 = vmatprep.subr.bf16.mxu1 %v2856_v8 }
 0x662   :  { %v2822_v1 = vpop.eup %2821 }
 0x663   :  { %2768 = vmatpush3.bf16.msra.mxu1 %v2969_v13  ;;  %2582 = vmatmul.mubr.msk.f32.vlgmr.msra.gmra.mrb[22].mxu0 %vm221_vm3, %v2822_v1  ;;  %v2002_v13 = vld [vmem:[%s3293_s8 + $0x8] sm:$0xff] }
 0x664   :  { %2771 = vmatpush3.bf16.msra.mxu0 %v2990_v18  ;;  %2775 = vmatprep.subr.bf16.mxu1 %v2856_v8  ;;  %v2781_v18 = vpack.c.bf16 %v2002_v13, %v2001_v6 }
 0x665   :  { %2772 = vmatprep.subr.bf16.mxu0 %v2856_v8  ;;  %2603 = vmatprep.mubr.msk.f32.mxu0 %vm2857_vm2, %v2858_v14  ;;  %v1998_v19 = vld [vmem:[#allocation2 + $0x28] sm:$0xff] }
 0x666   :  { %2593 = vmatmul.mubr.msk.f32.vlgmr.msra.gmra.mrb[26].mxu1 %vm221_vm3, %v2822_v1 }
 0x667   :  { %2777 = vmatpush3.bf16.msra.mxu1 %v3010_v25  ;;  %2614 = vmatprep.mubr.msk.f32.mxu1 %vm2857_vm2, %v2858_v14 }
 0x668   :  { %2774 = vmatpush3.bf16.msra.mxu0 %v3000_v21  ;;  %2778 = vmatprep.subr.bf16.mxu1 %v2856_v8  ;;  %v215_v8 = vadd.f32 %v3050_v35, %v3048_v34  ;;  %v1993_v34 = vld [vmem:[#allocation2] sm:$0xff]  ;;  %v1994_v35 = vld [vmem:[#allocation2 + $0x8] sm:$0xff] }
 0x669   :  { %2782 = vmatprep.subr.bf16.mxu0 %v2781_v18 }
 0x66b   :  { %2780 = vmatpush3.bf16.msra.mxu1 %v3027_v30 }
 0x731   :  { %v1692_v25 = vpop.f32.mrb[24].mxu1 }
 0x732   :  { %v2572_v37 = vpop.f32.mrb[25].mxu1 }
 0x736   :  { %v1765_v2 = vpop.f32.mrb[22].mxu0 }
 0x737   :  { %v1766_v14 = vadd.f32 %v1765_v2, %v1692_v25  ;;  %v2583_v3 = vpop.f32.mrb[23].mxu0 }
 0x739   :  { %v1769_v21 = vadd.f32 %v3075_v48, %v1766_v14  ;;  %v1838_v30 = vpop.f32.mrb[26].mxu1 }
 0x73a   :  { %v1842_v4 = vadd.f32 %v1838_v30, %v215_v8  ;;  %v2594_v5 = vpop.f32.mrb[27].mxu1 }
 0x73b   :  { %2823 = vtanh.f32 %v1769_v21 }
 0x73c   :  { %2825 = vtanh.f32 %v1842_v4 }
 0x745   :  { %v2824_v11 = vpop.eup %2823 }
 0x746   :  { %v2826_v12 = vpop.eup %2825  ;;  %1771 = vst.msk [vmem:[#allocation2 + $0x30] sm:$0xff] %vm221_vm3, %v2824_v11  ;;  %2604 = vmatmul.mubr.msk.f32.vlgmr.msra.gmra.mrb[24].mxu0 %vm221_vm3, %v2824_v11 }
 0x747   :  { %2615 = vmatmul.mubr.msk.f32.vlgmr.msra.gmra.mrb[28].mxu1 %vm221_vm3, %v2826_v12  ;;  %2784 = vmatpush3.bf16.msra.mxu0 %v2781_v18 }
 0x748   :  { %2625 = vmatprep.mubr.msk.f32.mxu0 %vm221_vm3, %v1993_v34  ;;  %2786 = vmatprep.subr.bf16.mxu0 %v2785_v10 }
 0x74b   :  { %2788 = vmatpush3.bf16.msra.mxu0 %v2785_v10 }
 0x74d   :  { %v1999_v20 = vld [vmem:[#allocation2 + $0x30] sm:$0xff] }
 0x74e   :  { %2626 = vmatmul.mubr.msk.f32.vlgmr.msra.gmra.mrb[26].mxu0 %vm221_vm3, %v1994_v35 }
 0x74f   :  { %2628 = vmatprep.mubr.msk.f32.mxu0 %vm221_vm3, %v1995_v15 }
 0x752   :  { %2629 = vmatmul.mubr.msk.f32.gmra.mrb[28].mxu0 %vm221_vm3, %v1996_v16 }
 0x753   :  { %2631 = vmatprep.mubr.msk.f32.mxu0 %vm221_vm3, %v1997_v17 }
 0x756   :  { %2632 = vmatmul.mubr.msk.f32.gmra.mrb[30].mxu0 %vm221_vm3, %v1998_v19 }
 0x757   :  { %2634 = vmatprep.mubr.msk.f32.mxu0 %vm221_vm3, %v1999_v20 }
 0x819   :  { %v1913_v22 = vpop.f32.mrb[24].mxu0 }
 0x81a   :  { %v1986_v23 = vpop.f32.mrb[28].mxu1  ;;  %v2605_v24 = vpop.f32.mrb[25].mxu0 }
 0x81b   :  { %v1987_v26 = vadd.f32 %v1986_v23, %v1913_v22  ;;  %v2616_v27 = vpop.f32.mrb[29].mxu1 }
 0x81d   :  { %v1990_v28 = vadd.f32 %v3075_v48, %v1987_v26 }
 0x81f   :  { %2827 = vtanh.f32 %v1990_v28 }
 0x821   :  { %v2627_v33 = vpop.f32.mrb[26].mxu0 }
 0x822   :  { %v2108_v36 = vadd.f32 %v2627_v33, %v2189_v29  ;;  %v2102_v38 = vpop.f32.mrb[27].mxu0 }
 0x823   :  { %v2103_v39 = vadd.f32 %v2189_v29, %v2102_v38 }
 0x824   :  { %2142 = vst.msk [vmem:[%s3295_s10 + $0x8] sm:$0xff] %vm84_vm1, %v2108_v36 }
 0x825   :  { %2141 = vst.msk [vmem:[%s3295_s10] sm:$0xff] %vm84_vm1, %v2103_v39  ;;  %v2630_v48 = vpop.f32.mrb[28].mxu0 }
 0x826   :  { %v2118_v40 = vadd.f32 %v2630_v48, %v2189_v29  ;;  %v2112_v41 = vpop.f32.mrb[29].mxu0 }
 0x827   :  { %v2113_v42 = vadd.f32 %v2189_v29, %v2112_v41 }
 0x828   :  { %2144 = vst.msk [vmem:[%s3295_s10 + $0x18] sm:$0xff] %vm84_vm1, %v2118_v40 }
 0x829   :  { %v2828_v32 = vpop.eup %2827  ;;  %2143 = vst.msk [vmem:[%s3295_s10 + $0x10] sm:$0xff] %vm84_vm1, %v2113_v42  ;;  %v2633_v43 = vpop.f32.mrb[30].mxu0 }
 0x82a   :  { %1992 = vst.msk [vmem:[#allocation2 + $0x38] sm:$0xff] %vm221_vm3, %v2828_v32  ;;  %v2128_v44 = vadd.f32 %v2633_v43, %v2189_v29  ;;  %v2122_v45 = vpop.f32.mrb[31].mxu0 }
 0x82b   :  { %v2123_v46 = vadd.f32 %v2189_v29, %v2122_v45 }
 0x82c   :  { %2146 = vst.msk [vmem:[%s3295_s10 + $0x28] sm:$0xff] %vm84_vm1, %v2128_v44 }
 0x82d   :  { %2145 = vst.msk [vmem:[%s3295_s10 + $0x20] sm:$0xff] %vm84_vm1, %v2123_v46 }
 0x831   :  { %v2000_v47 = vld [vmem:[#allocation2 + $0x38] sm:$0xff] }
 0x832   :  { %2635 = vmatmul.mubr.msk.f32.gmra.mrb[32].mxu0 %vm221_vm3, %v2000_v47 }
 0x905   :  { %v2636_v49 = vpop.f32.mrb[32].mxu0 }
 0x906   :  { %v2138_v50 = vadd.f32 %v2636_v49, %v2189_v29  ;;  %v2132_v51 = vpop.f32.mrb[33].mxu0 }
 0x907   :  { %v2133_v52 = vadd.f32 %v2189_v29, %v2132_v51 }
 0x908   :  { %2148 = vst.msk [vmem:[%s3295_s10 + $0x38] sm:$0xff] %vm84_vm1, %v2138_v50 }
 0x909   :  { %2147 = vst.msk [vmem:[%s3295_s10 + $0x30] sm:$0xff] %vm84_vm1, %v2133_v52 }
 0x90a   :  { %2153 = vsyncpa [#allocation4], 1 }

</bundles_post_ra>
